<compile_context>
chip_gen: v6e
topology: v6e:2x2x1
jax: 0.10.0
libtpu: 0.0.40
codegen_flags: <defaults>
</compile_context>

<pallas_src>
import math
import functools

import jax
import jax.numpy as jnp
from jax import lax
from jax.experimental import pallas as pl
from jax.experimental.pallas import tpu as pltpu

_LANE = 128


def mha_kernel(q_ref, k_ref, v_ref, wqh_ref, bqh_ref, wkh_ref, bkh_ref, o_ref,
               *, h, use_bf16_exp):
    """One grid step over Bt batch rows.

    q_ref / k_ref  : (Bt, S, D)    activations (f32)
    v_ref          : (Bt, S)       per-key scalar value, lane-dense (f32)
    wqh_ref/wkh_ref: (h, D, d_kp)  per-head pre-transposed, pre-scaled weight
                                   slabs (bf16, lane-padded to d_kp)
    bqh_ref/bkh_ref: (h, 1, d_kp)  per-head biases (f32, lane-padded)
    o_ref          : (Bt, S)       lane-dense output = mean over heads
    """
    bt, s_len, d_model = q_ref.shape
    d_kp = wqh_ref.shape[-1]
    rows = bt * s_len

    # Activations narrowed to bf16 once (MXU inputs); softmax math stays f32.
    xq = q_ref[...].reshape(rows, d_model).astype(jnp.bfloat16)
    xk = k_ref[...].reshape(rows, d_model).astype(jnp.bfloat16)

    def head_body(i, p_sum):
        # Per-head projection as (rows, D) @ (D, d_kp) MXU matmuls: avoids
        # sub-128-lane slices of a fused projection (no relayout copies) and
        # keeps only this head's (Bt, S, S) intermediates live.
        qh = jnp.dot(xq, wqh_ref[i], preferred_element_type=jnp.float32) + bqh_ref[i]
        kh = jnp.dot(xk, wkh_ref[i], preferred_element_type=jnp.float32) + bkh_ref[i]
        qh3 = qh.astype(jnp.bfloat16).reshape(bt, s_len, d_kp)
        kh3 = kh.astype(jnp.bfloat16).reshape(bt, s_len, d_kp)
        # batched over Bt, contract the (padded) head dim; padded lanes are
        # exactly zero on BOTH sides so they contribute nothing to the scores.
        scores = lax.dot_general(
            qh3, kh3, (((2,), (2,)), ((0,), (0,))),
            preferred_element_type=jnp.float32)                # (Bt, S, S) f32
        m = jnp.max(scores, axis=-1, keepdims=True)
        z = scores - m
        if use_bf16_exp:
            # v6e/v7x: bf16 EUP ~doubles exp throughput; inputs are <= 0 so
            # low-precision large-magnitude entries map to negligible probs.
            e = jnp.exp(z.astype(jnp.bfloat16)).astype(jnp.float32)
        else:
            e = jnp.exp(z)
        denom = jnp.sum(e, axis=-1, keepdims=True)
        # EUP reciprocal + VPU multiply instead of a broadcast divide.
        return p_sum + e * pl.reciprocal(denom, approx=True)

    # mean-over-heads commutes with the (S,S)@(S,1) matvec: accumulate
    # sum_h softmax(s_h), then ONE value multiply + lane reduction at the end.
    # lax.fori_loop bounds live ranges to one head's intermediates.
    p_sum = lax.fori_loop(
        0, h, head_body, jnp.zeros((bt, s_len, s_len), jnp.float32))

    v_scaled = v_ref[...] * (1.0 / h)                      # (Bt, S), folds 1/h
    out = jnp.sum(p_sum * v_scaled[:, None, :], axis=-1)   # (Bt, S) lane-dense
    o_ref[...] = out.astype(o_ref.dtype)


def _tpu_config():
    """Generation-aware knobs: (is_2core, bf16_exp_ok, vmem_limit_bytes)."""
    kind = ""
    try:
        kind = jax.devices()[0].device_kind.lower()
    except Exception:
        pass
    is_v7 = "v7" in kind
    bf16_exp_ok = ("v6" in kind) or is_v7      # v5e and older: no bf16 EUP
    vmem_physical = (64 if is_v7 else 128) * 1024 * 1024
    try:
        info = pltpu.get_tpu_info()
        vmem_physical = int(getattr(info, "vmem_capacity_bytes", vmem_physical))
    except Exception:
        pass
    # Leave headroom below physical for compiler scratch / double buffers.
    vmem_limit = min((40 if is_v7 else 64) * 1024 * 1024,
                     int(0.625 * vmem_physical))
    return is_v7, bf16_exp_ok, vmem_limit


def _pick_block_b(nb, s_len, d_model, d_kp, h, vmem_limit, two_cores):
    """Largest batch tile Bt such that
       * Bt divides nb,
       * Bt is a multiple of 8 or equals nb (dense 2D value/output blocks
         satisfy the (8,128) block constraint),
       * the estimated per-step VMEM footprint fits ~60% of vmem_limit,
       preferring (on 2-TensorCore parts only) a grid of >= 2 steps."""
    budget = int(0.6 * vmem_limit)

    def footprint(bt):
        rows = bt * s_len
        qk_blocks = 2 * 2 * bt * s_len * d_model * 4     # q,k double-buffered f32
        vo_blocks = 2 * 2 * bt * s_len * 4                # value + out blocks
        weights = 2 * 2 * (h * d_model * d_kp * 2 + h * d_kp * 4)
        acts = 2 * rows * d_model * 2                     # xq, xk bf16
        ss = 3 * bt * s_len * s_len * 4                   # p_sum + scores + e
        head_qk = 2 * rows * d_kp * (4 + 2)               # one head's qh/kh
        return qk_blocks + vo_blocks + weights + acts + ss + head_qk

    cands = [b for b in range(1, nb + 1)
             if nb % b == 0 and (b == nb or b % 8 == 0)]
    fitting = [b for b in cands if footprint(b) <= budget]
    pool = fitting if fitting else [min(cands)]   # smallest legal tile fallback
    if two_cores:
        parallel = [b for b in pool if nb // b >= 2]
        if parallel:                              # keep both TensorCores busy
            return max(parallel)
    return max(pool)


def multi_headed_attention(query, key, value, wq, bq, wk, bk, *, h):
    """query/key: (B, S, D) f32; value: (B, S) f32. Returns (B, S, 1)."""
    nb, s_len, d_model = query.shape
    assert d_model % h == 0
    d_k = d_model // h
    assert key.shape == (nb, s_len, d_model)
    assert value.shape == (nb, s_len)

    is_v7, bf16_exp_ok, vmem_limit = _tpu_config()

    # Pad each head's d_k to a full lane multiple so qh/kh are lane-dense.
    d_kp = max(_LANE, ((d_k + _LANE - 1) // _LANE) * _LANE)
    pad = d_kp - d_k

    bt = _pick_block_b(nb, s_len, d_model, d_kp, h, vmem_limit, two_cores=is_v7)
    grid = (nb // bt,)

    # Grid-invariant prep (one-time, fused by XLA):
    #  * 1/sqrt(d_k) folded into the q-side weight + bias
    #  * weights split into per-head pre-transposed (D, d_kp) bf16 slabs
    #  * biases as (h, 1, d_kp) f32; padded lanes are zero on both q and k.
    scale = 1.0 / math.sqrt(d_k)

    def per_head(w, b, s):
        w = jnp.asarray(w, jnp.float32) * s                    # torch (out, in)
        b = jnp.asarray(b, jnp.float32) * s
        wh = w.reshape(h, d_k, d_model).transpose(0, 2, 1)     # (h, D_in, d_k)
        bh = b.reshape(h, 1, d_k)
        if pad:
            wh = jnp.pad(wh, ((0, 0), (0, 0), (0, pad)))
            bh = jnp.pad(bh, ((0, 0), (0, 0), (0, pad)))
        return wh.astype(jnp.bfloat16), bh

    wqh, bqh = per_head(wq, bq, scale)
    wkh, bkh = per_head(wk, bk, 1.0)

    kernel = functools.partial(mha_kernel, h=h, use_bf16_exp=bf16_exp_ok)

    flops = (2 * 2 * nb * s_len * d_model * d_kp * h   # per-head q/k projections
             + 2 * nb * h * s_len * s_len * d_kp       # scores
             + 2 * nb * s_len * s_len)                 # prob-sum x value reduce
    transcendentals = nb * h * s_len * s_len           # exp
    bytes_accessed = (2 * nb * s_len * d_model * 4     # q, k in
                      + nb * s_len * 4                 # value in
                      + 2 * h * d_model * d_kp * 2     # bf16 weight slabs
                      + 2 * h * d_kp * 4               # biases
                      + nb * s_len * 4)                # out

    # TODO(synk): for very large d_model, mark the grid-invariant weight/bias
    # specs pipeline_mode=pl.Buffered(1) to drop their second VMEM buffer
    # (matters on v7x's 64 MiB VMEM; negligible at this d_model).
    out = pl.pallas_call(
        kernel,
        out_shape=jax.ShapeDtypeStruct((nb, s_len), query.dtype),
        grid_spec=pltpu.PrefetchScalarGridSpec(
            num_scalar_prefetch=0,
            grid=grid,
            in_specs=[
                pl.BlockSpec((bt, s_len, d_model), lambda b: (b, 0, 0)),  # query
                pl.BlockSpec((bt, s_len, d_model), lambda b: (b, 0, 0)),  # key
                pl.BlockSpec((bt, s_len), lambda b: (b, 0)),              # value
                pl.BlockSpec((h, d_model, d_kp), lambda b: (0, 0, 0)),    # Wq heads
                pl.BlockSpec((h, 1, d_kp), lambda b: (0, 0, 0)),          # bq heads
                pl.BlockSpec((h, d_model, d_kp), lambda b: (0, 0, 0)),    # Wk heads
                pl.BlockSpec((h, 1, d_kp), lambda b: (0, 0, 0)),          # bk heads
            ],
            out_specs=pl.BlockSpec((bt, s_len), lambda b: (b, 0)),
        ),
        compiler_params=pltpu.CompilerParams(
            dimension_semantics=("parallel",),
            vmem_limit_bytes=vmem_limit),
        cost_estimate=pl.CostEstimate(
            flops=flops,
            transcendentals=transcendentals,
            bytes_accessed=bytes_accessed),
    )(query, key, value, wqh, bqh, wkh, bkh)

    # (B, S) -> (B, S, 1): metadata-only reshape.
    return out.reshape(nb, s_len, 1)


def mha_reference(query, key, value, wq, bq, wk, bk, *, h):
    """Pure-JAX f32 mirror of the PyTorch forward (eval-mode dropout, mask=None)."""
    nb, s_len, d_model = query.shape
    d_k = d_model // h
    q = (query @ wq.T + bq).reshape(nb, s_len, h, d_k).transpose(0, 2, 1, 3)
    k = (key @ wk.T + bk).reshape(nb, s_len, h, d_k).transpose(0, 2, 1, 3)
    v = jnp.broadcast_to(value[:, None, :, None], (nb, h, s_len, 1))
    scores = jnp.einsum('bhqd,bhkd->bhqk', q, k) / math.sqrt(d_k)
    p = jax.nn.softmax(scores, axis=-1)
    x = jnp.einsum('bhqk,bhkl->bhql', p, v)
    return jnp.mean(x, axis=1)   # mean over heads -> (nb, S, 1)


if __name__ == "__main__":
    # small shapes consistent with the module
    B, S, D, H = 2, 8, 32, 4

    key0 = jax.random.PRNGKey(0)
    kq, kk, kv, kwq, kbq, kwk, kbk = jax.random.split(key0, 7)

    query = jax.random.normal(kq, (B, S, D), dtype=jnp.float32)
    key_in = jax.random.normal(kk, (B, S, D), dtype=jnp.float32)
    value = jax.random.normal(kv, (B, S), dtype=jnp.float32)

    # deterministic nn.Linear-style init: U(-1/sqrt(D), 1/sqrt(D))
    bound = 1.0 / math.sqrt(D)
    wq = jax.random.uniform(kwq, (D, D), jnp.float32, -bound, bound)
    bq = jax.random.uniform(kbq, (D,), jnp.float32, -bound, bound)
    wk = jax.random.uniform(kwk, (D, D), jnp.float32, -bound, bound)
    bk = jax.random.uniform(kbk, (D,), jnp.float32, -bound, bound)

    out = multi_headed_attention(query, key_in, value, wq, bq, wk, bk, h=H)
    out = jax.block_until_ready(out)

    ref = mha_reference(query, key_in, value, wq, bq, wk, bk, h=H)
    assert out.shape == (B, S, 1), out.shape
    max_err = float(jnp.max(jnp.abs(out - ref)))
    # accuracy contract: bf16 MXU inputs, bf16 exp on v6e/v7x, and approx
    # reciprocal => per-head softmax rows sum to 1 only to ~1e-2.
    assert jnp.allclose(out, ref, rtol=2e-2, atol=2e-2), max_err

    print("KERNEL_OK")
</pallas_src>

<mosaic_0001>
module attributes {stable_mosaic.version = 11 : i64} {
  func.func @mha_kernel(%arg0: i32, %arg1: memref<2x8x32xf32, #tpu.memory_space<vmem>>, %arg2: memref<2x8x32xf32, #tpu.memory_space<vmem>>, %arg3: memref<2x8xf32, #tpu.memory_space<vmem>>, %arg4: memref<4x32x128xbf16, #tpu.memory_space<vmem>>, %arg5: memref<4x1x128xf32, #tpu.memory_space<vmem>>, %arg6: memref<4x32x128xbf16, #tpu.memory_space<vmem>>, %arg7: memref<4x1x128xf32, #tpu.memory_space<vmem>>, %arg8: memref<2x8xf32, #tpu.memory_space<vmem>>) attributes {dimension_semantics = [#tpu.dimension_semantics<parallel>], iteration_bounds = array<i64: 1>, scalar_prefetch = 0 : i64, scratch_operands = 0 : i64, tpu.core_type = #tpu.core_type<tc>, window_params = [{transform_indices = @transform_0, window_bounds = array<i64: 2, 8, 32>}, {transform_indices = @transform_1, window_bounds = array<i64: 2, 8, 32>}, {transform_indices = @transform_2, window_bounds = array<i64: 2, 8>}, {pipeline_mode = #tpu.pipeline_mode<synchronous>, transform_indices = @transform_3, window_bounds = array<i64: 4, 32, 128>}, {pipeline_mode = #tpu.pipeline_mode<synchronous>, transform_indices = @transform_4, window_bounds = array<i64: 4, 1, 128>}, {pipeline_mode = #tpu.pipeline_mode<synchronous>, transform_indices = @transform_5, window_bounds = array<i64: 4, 32, 128>}, {pipeline_mode = #tpu.pipeline_mode<synchronous>, transform_indices = @transform_6, window_bounds = array<i64: 4, 1, 128>}, {transform_indices = @transform_7, window_bounds = array<i64: 2, 8>}]} {
    %c0 = arith.constant 0 : index
    %c0_0 = arith.constant 0 : index
    %c0_1 = arith.constant 0 : index
    %0 = vector.load %arg1[%c0, %c0_0, %c0_1] : memref<2x8x32xf32, #tpu.memory_space<vmem>>, vector<2x8x32xf32>
    %1 = vector.shape_cast %0 : vector<2x8x32xf32> to vector<16x32xf32>
    %2 = arith.truncf %1 : vector<16x32xf32> to vector<16x32xbf16>
    %c0_2 = arith.constant 0 : index
    %c0_3 = arith.constant 0 : index
    %c0_4 = arith.constant 0 : index
    %3 = vector.load %arg2[%c0_2, %c0_3, %c0_4] : memref<2x8x32xf32, #tpu.memory_space<vmem>>, vector<2x8x32xf32>
    %4 = vector.shape_cast %3 : vector<2x8x32xf32> to vector<16x32xf32>
    %5 = arith.truncf %4 : vector<16x32xf32> to vector<16x32xbf16>
    %cst = arith.constant 0.000000e+00 : f32
    %6 = vector.broadcast %cst : f32 to vector<2x8x8xf32>
    %c0_i32 = arith.constant 0 : i32
    %c4_i32 = arith.constant 4 : i32
    %7 = arith.addi %c0_i32, %c4_i32 : i32
    %c1_i32 = arith.constant 1 : i32
    %8 = scf.for %arg9 = %c0_i32 to %7 step %c1_i32 iter_args(%arg10 = %6) -> (vector<2x8x8xf32>)  : i32 {
      %17 = arith.index_cast %arg9 : i32 to index
      %c0_12 = arith.constant 0 : index
      %c0_13 = arith.constant 0 : index
      %18 = vector.load %arg4[%17, %c0_12, %c0_13] : memref<4x32x128xbf16, #tpu.memory_space<vmem>>, vector<1x32x128xbf16>
      %19 = vector.shape_cast %18 : vector<1x32x128xbf16> to vector<32x128xbf16>
      %cst_14 = arith.constant dense<0.000000e+00> : vector<16x128xf32>
      %20 = tpu.matmul %2, %19, %cst_14 {dimension_numbers = #tpu.dot_dimension_numbers<[1], [0], [0], [1], [0, 0, 1, 1], [], []>} : vector<16x32xbf16>, vector<32x128xbf16>, vector<16x128xf32> -> vector<16x128xf32>
      %21 = arith.index_cast %arg9 : i32 to index
      %c0_15 = arith.constant 0 : index
      %c0_16 = arith.constant 0 : index
      %22 = vector.load %arg5[%21, %c0_15, %c0_16] : memref<4x1x128xf32, #tpu.memory_space<vmem>>, vector<1x1x128xf32>
      %23 = vector.shape_cast %22 : vector<1x1x128xf32> to vector<1x128xf32>
      %24 = vector.broadcast %23 : vector<1x128xf32> to vector<16x128xf32>
      %25 = arith.addf %20, %24 : vector<16x128xf32>
      %26 = arith.index_cast %arg9 : i32 to index
      %c0_17 = arith.constant 0 : index
      %c0_18 = arith.constant 0 : index
      %27 = vector.load %arg6[%26, %c0_17, %c0_18] : memref<4x32x128xbf16, #tpu.memory_space<vmem>>, vector<1x32x128xbf16>
      %28 = vector.shape_cast %27 : vector<1x32x128xbf16> to vector<32x128xbf16>
      %cst_19 = arith.constant dense<0.000000e+00> : vector<16x128xf32>
      %29 = tpu.matmul %5, %28, %cst_19 {dimension_numbers = #tpu.dot_dimension_numbers<[1], [0], [0], [1], [0, 0, 1, 1], [], []>} : vector<16x32xbf16>, vector<32x128xbf16>, vector<16x128xf32> -> vector<16x128xf32>
      %30 = arith.index_cast %arg9 : i32 to index
      %c0_20 = arith.constant 0 : index
      %c0_21 = arith.constant 0 : index
      %31 = vector.load %arg7[%30, %c0_20, %c0_21] : memref<4x1x128xf32, #tpu.memory_space<vmem>>, vector<1x1x128xf32>
      %32 = vector.shape_cast %31 : vector<1x1x128xf32> to vector<1x128xf32>
      %33 = vector.broadcast %32 : vector<1x128xf32> to vector<16x128xf32>
      %34 = arith.addf %29, %33 : vector<16x128xf32>
      %35 = arith.truncf %25 : vector<16x128xf32> to vector<16x128xbf16>
      %36 = vector.shape_cast %35 : vector<16x128xbf16> to vector<2x8x128xbf16>
      %37 = arith.truncf %34 : vector<16x128xf32> to vector<16x128xbf16>
      %38 = vector.shape_cast %37 : vector<16x128xbf16> to vector<2x8x128xbf16>
      %cst_22 = arith.constant dense<0.000000e+00> : vector<2x8x8xf32>
      %39 = tpu.matmul %36, %38, %cst_22 {dimension_numbers = #tpu.dot_dimension_numbers<[2], [2], [1], [1], [0, 0, 0, 1, 1, 1], [0], [0]>} : vector<2x8x128xbf16>, vector<2x8x128xbf16>, vector<2x8x8xf32> -> vector<2x8x8xf32>
      %cst_23 = arith.constant dense<0xFF800000> : vector<2x8xf32>
      %40 = vector.multi_reduction <maximumf>, %39, %cst_23 [2] : vector<2x8x8xf32> to vector<2x8xf32>
      %41 = vector.shape_cast %40 : vector<2x8xf32> to vector<2x8x1xf32>
      %42 = vector.broadcast %41 : vector<2x8x1xf32> to vector<2x8x8xf32>
      %43 = arith.subf %39, %42 : vector<2x8x8xf32>
      %44 = math.exp %43 : vector<2x8x8xf32>
      %cst_24 = arith.constant dense<0.000000e+00> : vector<2x8xf32>
      %45 = vector.multi_reduction <add>, %44, %cst_24 [2] : vector<2x8x8xf32> to vector<2x8xf32>
      %46 = vector.shape_cast %45 : vector<2x8xf32> to vector<2x8x1xf32>
      %47 = tpu.reciprocal %46 {approx = true} : vector<2x8x1xf32> -> vector<2x8x1xf32>
      %48 = vector.broadcast %47 : vector<2x8x1xf32> to vector<2x8x8xf32>
      %49 = arith.mulf %44, %48 : vector<2x8x8xf32>
      %50 = arith.addf %arg10, %49 : vector<2x8x8xf32>
      scf.yield %50 : vector<2x8x8xf32>
    }
    %c4_i32_5 = arith.constant 4 : i32
    %c0_6 = arith.constant 0 : index
    %c0_7 = arith.constant 0 : index
    %9 = vector.load %arg3[%c0_6, %c0_7] : memref<2x8xf32, #tpu.memory_space<vmem>>, vector<2x8xf32>
    %cst_8 = arith.constant 2.500000e-01 : f32
    %10 = vector.broadcast %cst_8 : f32 to vector<2x8xf32>
    %11 = arith.mulf %9, %10 : vector<2x8xf32>
    %12 = vector.shape_cast %11 : vector<2x8xf32> to vector<2x1x8xf32>
    %13 = vector.broadcast %12 : vector<2x1x8xf32> to vector<2x8x8xf32>
    %14 = arith.mulf %8, %13 : vector<2x8x8xf32>
    %cst_9 = arith.constant dense<0.000000e+00> : vector<2x8xf32>
    %15 = vector.multi_reduction <add>, %14, %cst_9 [2] : vector<2x8x8xf32> to vector<2x8xf32>
    %c0_10 = arith.constant 0 : index
    %c0_11 = arith.constant 0 : index
    %16 = vector.load %arg8[%c0_10, %c0_11] : memref<2x8xf32, #tpu.memory_space<vmem>>, vector<2x8xf32>
    tpu.vector_store %arg8[%c0_10, %c0_11], %15 {strides = array<i32>} : memref<2x8xf32, #tpu.memory_space<vmem>>, vector<2x8xf32>,
    return
  }
  func.func @transform_0(%arg0: i32) -> (i32, i32, i32) {
    %c0_i32 = arith.constant 0 : i32
    %c0_i32_0 = arith.constant 0 : i32
    %c0_i32_1 = arith.constant 0 : i32
    return %arg0, %c0_i32, %c0_i32_0 : i32, i32, i32
  }
  func.func @transform_1(%arg0: i32) -> (i32, i32, i32) {
    %c0_i32 = arith.constant 0 : i32
    %c0_i32_0 = arith.constant 0 : i32
    %c0_i32_1 = arith.constant 0 : i32
    return %arg0, %c0_i32, %c0_i32_0 : i32, i32, i32
  }
  func.func @transform_2(%arg0: i32) -> (i32, i32) {
    %c0_i32 = arith.constant 0 : i32
    %c0_i32_0 = arith.constant 0 : i32
    return %arg0, %c0_i32 : i32, i32
  }
  func.func @transform_3(%arg0: i32) -> (i32, i32, i32) {
    %c0_i32 = arith.constant 0 : i32
    %c0_i32_0 = arith.constant 0 : i32
    %c0_i32_1 = arith.constant 0 : i32
    %c0_i32_2 = arith.constant 0 : i32
    return %c0_i32, %c0_i32_0, %c0_i32_1 : i32, i32, i32
  }
  func.func @transform_4(%arg0: i32) -> (i32, i32, i32) {
    %c0_i32 = arith.constant 0 : i32
    %c0_i32_0 = arith.constant 0 : i32
    %c0_i32_1 = arith.constant 0 : i32
    %c0_i32_2 = arith.constant 0 : i32
    return %c0_i32, %c0_i32_0, %c0_i32_1 : i32, i32, i32
  }
  func.func @transform_5(%arg0: i32) -> (i32, i32, i32) {
    %c0_i32 = arith.constant 0 : i32
    %c0_i32_0 = arith.constant 0 : i32
    %c0_i32_1 = arith.constant 0 : i32
    %c0_i32_2 = arith.constant 0 : i32
    return %c0_i32, %c0_i32_0, %c0_i32_1 : i32, i32, i32
  }
  func.func @transform_6(%arg0: i32) -> (i32, i32, i32) {
    %c0_i32 = arith.constant 0 : i32
    %c0_i32_0 = arith.constant 0 : i32
    %c0_i32_1 = arith.constant 0 : i32
    %c0_i32_2 = arith.constant 0 : i32
    return %c0_i32, %c0_i32_0, %c0_i32_1 : i32, i32, i32
  }
  func.func @transform_7(%arg0: i32) -> (i32, i32) {
    %c0_i32 = arith.constant 0 : i32
    %c0_i32_0 = arith.constant 0 : i32
    return %arg0, %c0_i32 : i32, i32
  }
}

</mosaic_0001>

<bundles_post_ra>
// kernel: tpu_custom_call.1
= control target key start
LH: loop header
LB: loop body
LE: loop exit
PB: predicated region body
PF: predicated region fallthrough
CT: control target
= control target key end

     0   :  { %12 = vsyncpa [#allocation3], 0  ;;  %s864_s0 = inlined_call_operand.hbm [shape: f32[2,8,32], index: 0, kind: input, shape index: {}]   ;;  %s865_s1 = inlined_call_operand.hbm [shape: f32[2,8,32], index: 1, kind: input, shape index: {}]   ;;  %s866_s2 = inlined_call_operand.hbm [shape: f32[2,8], index: 2, kind: input, shape index: {}]   ;;  %s867_s3 = inlined_call_operand.hbm [shape: bf16[4,32,128], index: 3, kind: input, shape index: {}]   ;;  %s868_s4 = inlined_call_operand.vmem [shape: f32[4,1,128], index: 4, kind: input, shape index: {}]   ;;  %s869_s5 = inlined_call_operand.hbm [shape: bf16[4,32,128], index: 5, kind: input, shape index: {}]   ;;  %s870_s6 = inlined_call_operand.vmem [shape: f32[4,1,128], index: 6, kind: input, shape index: {}]   ;;  %s871_s7 = inlined_call_operand.hbm [shape: f32[2,8], index: 7, kind: output, shape index: {}]  }
   0x1   :  { %13 = vsyncpa [#allocation6], 0 }
   0x2   :  { %14 = vsyncpa [#allocation9], 0 }
   0x3   :  { %15 = vsyncpa [#allocation4], 0  ;;  %s726_s24 = smov [#allocation5]   ;;  %s727_s26 = smov [#allocation8]  }
   0x4   :  { %s33_s25 = sshll.u32 %s726_s24, 4  ;;  %s55_s27 = sshll.u32 %s727_s26, 4  ;;  %s34_s25 = int_to_ptr.vmem [resolvable:$true] %s33_s25  ;;  %s56_s27 = int_to_ptr.vmem [resolvable:$true] %s55_s27 }
   0x5   :  { %s582_s28 = scalar_lea.vmem %s34_s25, 256  ;;  %p587_p1 = scmp.lt.s32.totalorder %s34_s25, %s34_s25 }
   0x6   :  { %p583_p0 = scmp.ne.s32.totalorder %s34_s25, %s582_s28  ;;  %p588_p2 = scmp.lt.s32.totalorder %s582_s28, %s582_s28 }
   0x8   :  { %p589_p3 = por %p588_p2, %p587_p1 }
   0xa   :  { %p590_p4 = pnand %p589_p3, %p583_p0 }
   0xc   :  { %593 = shalt.err (!%p590_p4)
}
   0xd   :  { %s728_s29 = smov 128   ;;  %s729_s30 = smov 8  }
   0xe   :  { %39 = dma.hbm_to_vmem [thread:$0]  %s865_s1, 256, %s34_s25, [#allocation6], %s728_s29, %s728_s29, %s729_s30  }
   0xf   :  { %s602_s10 = scalar_lea.vmem %s56_s27, 1024  ;;  %p607_p6 = scmp.lt.s32.totalorder %s56_s27, %s56_s27 }
  0x10   :  { %p603_p5 = scmp.ne.s32.totalorder %s56_s27, %s602_s10  ;;  %p608_p7 = scmp.lt.s32.totalorder %s602_s10, %s602_s10 }
  0x12   :  { %p609_p8 = por %p608_p7, %p607_p6 }
  0x14   :  { %p610_p9 = pnand %p609_p8, %p603_p5 }
  0x16   :  { %613 = shalt.err (!%p610_p9)
}
  0x17   :  { %s730_s11 = smov 64   ;;  %s731_s12 = smov 4  }
  0x18   :  { %61 = dma.hbm_to_vmem [thread:$0]  %s867_s3, 1024, %s56_s27, [#allocation9], %s730_s11, %s730_s11, %s731_s12  }
  0x19   :  { %s732_s15 = smov [#allocation2]   ;;  %s733_s17 = smov [#allocation7]  }
  0x1a   :  { %s21_s16 = sshll.u32 %s732_s15, 4  ;;  %s46_s1 = sshll.u32 %s733_s17, 4  ;;  %s22_s16 = int_to_ptr.vmem [resolvable:$true] %s21_s16  ;;  %s47_s1 = int_to_ptr.vmem [resolvable:$true] %s46_s1 }
  0x1b   :  { %s622_s18 = scalar_lea.vmem %s22_s16, 256  ;;  %p627_p11 = scmp.lt.s32.totalorder %s22_s16, %s22_s16 }
  0x1c   :  { %p623_p10 = scmp.ne.s32.totalorder %s22_s16, %s622_s18  ;;  %p628_p12 = scmp.lt.s32.totalorder %s622_s18, %s622_s18 }
  0x1e   :  { %p629_p13 = por %p628_p12, %p627_p11 }
  0x20   :  { %p630_p0 = pnand %p629_p13, %p623_p10 }
  0x22   :  { %633 = shalt.err (!%p630_p0)
}
  0x23   :  { %27 = dma.hbm_to_vmem [thread:$0]  %s864_s0, 256, %s22_s16, [#allocation3], %s728_s29, %s728_s29, %s729_s30  }
  0x24   :  { %s642_s21 = scalar_lea.vmem %s47_s1, 32  ;;  %p647_p2 = scmp.lt.s32.totalorder %s47_s1, %s47_s1 }
  0x25   :  { %p643_p1 = scmp.ne.s32.totalorder %s47_s1, %s642_s21  ;;  %p648_p3 = scmp.lt.s32.totalorder %s642_s21, %s642_s21 }
  0x27   :  { %p649_p4 = por %p648_p3, %p647_p2 }
  0x29   :  { %p650_p5 = pnand %p649_p4, %p643_p1 }
  0x2b   :  { %653 = shalt.err (!%p650_p5)
}
  0x2c   :  { %49 = dma.hbm_to_vmem [thread:$0]  %s866_s2, 32, %s47_s1, [#allocation6]  }
  0x2d   :  { %s734_s23 = smov [#allocation10]  }
  0x2e   :  { %s69_s24 = sshll.u32 %s734_s23, 4  ;;  %s70_s24 = int_to_ptr.vmem [resolvable:$true] %s69_s24 }
  0x2f   :  { %s662_s25 = scalar_lea.vmem %s70_s24, 1024  ;;  %p667_p7 = scmp.lt.s32.totalorder %s70_s24, %s70_s24 }
  0x30   :  { %p663_p6 = scmp.ne.s32.totalorder %s70_s24, %s662_s25  ;;  %p668_p8 = scmp.lt.s32.totalorder %s662_s25, %s662_s25 }
  0x32   :  { %p669_p9 = por %p668_p8, %p667_p7 }
  0x34   :  { %p670_p10 = pnand %p669_p9, %p663_p6 }
  0x36   :  { %673 = shalt.err (!%p670_p10)
}
  0x37   :  { %75 = dma.hbm_to_vmem [thread:$0]  %s869_s5, 1024, %s70_s24, [#allocation9], %s730_s11, %s730_s11, %s731_s12  }
  0x38   :  { %706 = dma.done.wait [#allocation3], 256  }
  0x39   :  { %707 = vsyncadd [#allocation3], 4294967040 }
  0x3a   :  { %708 = dma.done.wait [#allocation6], 288  }
  0x3b   :  { %709 = vsyncadd [#allocation6], 4294967008 }
  0x3c   :  { %710 = dma.done.wait [#allocation9], 2048  }
  0x3d   :  { %711 = vsyncadd [#allocation9], 4294965248  ;;  %v800_v0 = vld [vmem:[#allocation2] sm:$0xff]  ;;  %v802_v1 = vld [vmem:[#allocation2 + $0x8] sm:$0xff]  ;;  %v812_v6 = vmov 0.0   ;;  %v814_v7 = vmov 0.0  }
  0x3e   :  { %v804_v2 = vld [vmem:[#allocation5] sm:$0xff]  ;;  %v96_v3 = vpack.c.bf16 %v802_v1, %v800_v0  ;;  %v808_v4 = vld [vmem:[#allocation5 + $0x8] sm:$0xff]  ;;  %s816_s2 = smov 0  }
  0x3f   :  { %v99_v5 = vpack.c.bf16 %v808_v4, %v804_v2 }
  0x40 LB: > { %v735_v8 = vmov 0.0   ;;  %s481_s5 = sshll.u32 %s724_s2, 4  ;;  %vm736_vm0 = vmmov 0   ;;  %vm135_vm1 = vcmask 261120   ;;  %s186_s8 = scalar_lea.vmem %s870_s6, %s724_s2  ;;  %vm346_vm2 = vcmask 64512   ;;  %s724_s2 = sphi %s816_s2, %s105_s2   ;;  %v720_v7 = vphi %v814_v7, %v873_v7   ;;  %v716_v6 = vphi %v812_v6, %v872_v6  }
  0x41   : > { %505 = vmatprep.subr.bf16.mxu1 %v735_v8  ;;  %497 = vmatprep.subr.bf16.mxu0 %v735_v8  ;;  %s181_s27 = scalar_lea.vmem [#allocation10], %s481_s5  ;;  %s110_s28 = scalar_lea.vmem [#allocation8], %s481_s5  ;;  %v473_v13 = vld [vmem:[%s186_s8] ss:$0 sm:$0xff] }
  0x42   : > { %509 = vmatprep.mubr.msk.bf16.mxu1 %vm736_vm0, %v735_v8  ;;  %501 = vmatprep.mubr.msk.bf16.mxu0 %vm736_vm0, %v735_v8  ;;  %v562_v9 = vld [vmem:[%s181_s27 + $0x8] sm:$0xff]   ;;  %v564_v11 = vld [vmem:[%s181_s27] sm:$0xff]   ;;  %s115_s11 = scalar_lea.vmem %s868_s4, %s724_s2  ;;  %s105_s2 = sadd.s32 1, %s724_s2  }
  0x43   : > { %v563_v10 = vld [vmem:[%s110_s28 + $0x8] sm:$0xff]   ;;  %506 = vmatpush3.bf16.msra.mxu1 %v562_v9  ;;  %v565_v12 = vld [vmem:[%s110_s28] sm:$0xff]   ;;  %p102_p11 = scmp.ge.s32.totalorder %s105_s2, 4  }
  0x44   : > { %498 = vmatpush3.bf16.msra.mxu0 %v563_v10  ;;  %507 = vmatprep.subr.bf16.mxu1 %v735_v8  ;;  %v468_v16 = vld [vmem:[%s115_s11] ss:$0 sm:$0xff]  ;;  %v377_v60 = vlaneseq (%p102_p11)  ;;  %v737_v61 = vmov (%p102_p11), 1966171168   ;;  %s738_s4 = smov (%p102_p11), [#allocation11]   ;;  %vm427_vm3 = vcmask (%p102_p11), 1041409  }
  0x45   : > { %499 = vmatprep.subr.bf16.mxu0 %v735_v8  ;;  %v371_v59 = vld [vmem:[#allocation7] sm:$0x3] (%p102_p11)  ;;  %v375_v62 = vunpack.c.l.s4 (%p102_p11), %v737_v61  ;;  %s438_s6 = sshll.u32 (%p102_p11), %s738_s4, 4  ;;  %vm430_vm4 = vcmask (%p102_p11), 58368   ;;  %s439_s6 = int_to_ptr.vmem [resolvable:$true] %s438_s6 }
  0x46   :  { %v378_v63 = vshrl.u32 (%p102_p11), %v377_v60, 7  ;;  %s674_s12 = scalar_lea.vmem (%p102_p11), %s439_s6, 32  ;;  %p679_p13 = scmp.lt.s32.totalorder (%p102_p11), %s439_s6, %s439_s6 }
  0x47   : > { %508 = vmatpush3.bf16.msra.mxu1 %v564_v11  ;;  %v376_v9 = vunpack.c.0.s8 (%p102_p11), %v375_v62  ;;  %p675_p12 = scmp.ne.s32.totalorder (%p102_p11), %s439_s6, %s674_s12  ;;  %p680_p0 = scmp.lt.s32.totalorder (%p102_p11), %s674_s12, %s674_s12 }
  0x48   : > { %500 = vmatpush3.bf16.msra.mxu0 %v565_v12  ;;  %519 = vmatprep.subr.bf16.mxu1 %v735_v8 }
  0x49   : > { %513 = vmatprep.subr.bf16.mxu0 %v735_v8  ;;  %v379_v11 = vsub.s32 (%p102_p11), %v376_v9, %v378_v63  ;;  %p681_p1 = por (%p102_p11), %p680_p0, %p679_p13 }
  0x4a   : > { %510 = vmatmul.mubr.msk.bf16.vlgmr.msra.gmra.mxu1 %vm135_vm1, %v99_v5 }
  0x4b   : > { %502 = vmatmul.mubr.msk.bf16.vlgmr.msra.gmra.mxu0 %vm135_vm1, %v96_v3  ;;  %521 = vmatprep.mubr.msk.bf16.mxu1 %vm736_vm0, %v735_v8  ;;  %p682_p2 = pnand (%p102_p11), %p681_p1, %p675_p12 }
  0x4c   : > { %515 = vmatprep.mubr.msk.bf16.mxu0 %vm736_vm0, %v735_v8  ;;  %v372_v8 = vmul.f32 (%p102_p11), 0.25, %v371_v59 }
  0x4e   :  { %v380_v12 = vrot.slane (%p102_p11), %v372_v8, %v379_v11 }
 0x10a   : > { %v243_v14 = vpop.f32.mrf.mxu1 }
 0x10b   : > { %v244_v15 = vadd.f32 %v473_v13, %v243_v14  ;;  %v173_v17 = vpop.f32.mrf.mxu0  ;;  %v388_v14 = vrot.slane (%p102_p11), %v380_v12, %v379_v11 }
 0x10c   : > { %v511_v18 = vpop.f32.mrf.mxu1  ;;  %v174_v21 = vadd.f32 %v468_v16, %v173_v17 }
 0x10d   : > { %v485_v19 = vpack.c.bf16 %v244_v15, %v244_v15  ;;  %v503_v20 = vpop.f32.mrf.mxu0  ;;  %v381_v15 = vcombine.high (%p102_p11), %v380_v12, %v380_v12 }
 0x10e   : > { %v246_v22 = vpop.f32.mrf.mxu1  ;;  %v483_v28 = vpack.c.bf16 %v174_v21, %v174_v21 }
 0x10f   : > { %v247_v23 = vadd.f32 %v473_v13, %v246_v22  ;;  %514 = vmatpush3.bf16.xpose.msra.mxu0 %v485_v19  ;;  %v176_v24 = vpop.f32.mrf.mxu0  ;;  %v398_v13 = vsub.s32 (%p102_p11), 0, %v378_v63  ;;  %v395_v17 = vrot.slane (%p102_p11), %v381_v15, %v379_v11 }
 0x110   : > { %v512_v25 = vpop.f32.mrf.mxu1  ;;  %v177_v29 = vadd.f32 %v468_v16, %v176_v24 }
 0x111   : > { %v486_v26 = vpack.c.bf16 %v247_v23, %v247_v23  ;;  %v504_v27 = vpop.f32.mrf.mxu0  ;;  %v399_v16 = vrot.slane (%p102_p11), %v388_v14, %v398_v13  ;;  %v403_v19 = vrot.slane (%p102_p11), %v395_v17, %v398_v13 }
 0x112   : > { %v484_v30 = vpack.c.bf16 %v177_v29, %v177_v29 }
 0x113   : > { %520 = vmatpush3.bf16.xpose.msra.mxu1 %v486_v26 }
 0x116   : > { %516 = vmatmul.mubr.bf16.vlgmr.msra.gmra.mxu0 %v483_v28 }
 0x11a   : > { %522 = vmatmul.mubr.bf16.vlgmr.msra.gmra.mxu1 %v484_v30 }
 0x1d6   : > { %v300_v31 = vpop.f32.mrf.mxu0 }
 0x1d7   : > { %v347_v32 = vsel %vm346_vm2, %v300_v31, -inf }
 0x1d8   : > { %348 = vmax.xlane.f32.xlu0 %v347_v32  ;;  %v517_v33 = vpop.f32.mrf.mxu0 }
 0x1da   : > { %v303_v34 = vpop.f32.mrf.mxu0  ;;  %v340_v35 = vpop.f32.mrf.mxu1 }
 0x1db   : > { %v350_v36 = vsel %vm346_vm2, %v340_v35, -inf }
 0x1dc   : > { %v523_v37 = vpop.f32.mrf.mxu1  ;;  %351 = vmax.xlane.f32.xlu0 %v350_v36  ;;  %v518_v38 = vpop.f32.mrf.mxu0 }
 0x1de   : > { %v343_v39 = vpop.f32.mrf.mxu1 }
 0x1e0   : > { %v524_v40 = vpop.f32.mrf.mxu1 }
 0x261   : > { %v349_v41 = vpop.xlane.xlu0 %348 }
 0x262   : > { %v353_v42 = vsub.f32 %v300_v31, %v349_v41 }
 0x264   : > { %v355_v43 = vmul.f32 1.442695, %v353_v42 }
 0x265   : > { %v352_v44 = vpop.xlane.xlu0 %351 }
 0x266   : > { %566 = vpow2.f32 %v355_v43  ;;  %v354_v45 = vsub.f32 %v340_v35, %v352_v44 }
 0x268   : > { %v357_v46 = vmul.f32 1.442695, %v354_v45 }
 0x26a   : > { %568 = vpow2.f32 %v357_v46 }
 0x273   : > { %v567_v47 = vpop.eup %566 }
 0x274   : > { %v359_v48 = vsel %vm346_vm2, %v567_v47, 0.0 }
 0x275   : > { %360 = vadd.xlane.f32.xlu1 %v359_v48 }
 0x277   : > { %v569_v49 = vpop.eup %568 }
 0x278   : > { %v362_v50 = vsel %vm346_vm2, %v569_v49, 0.0 }
 0x279   : > { %363 = vadd.xlane.f32.xlu1 %v362_v50 }
 0x2fe   : > { %v361_v51 = vpop.xlane.xlu1 %360 }
 0x2ff   : > { %570 = vrcp.f32 %v361_v51 }
 0x302   : > { %v364_v52 = vpop.xlane.xlu1 %363 }
 0x303   : > { %572 = vrcp.f32 %v364_v52 }
 0x30c   : > { %v571_v53 = vpop.eup %570 }
 0x30d   : > { %v367_v54 = vmul.f32 %v571_v53, %v567_v47 }
 0x30f   : > { %v369_v55 = vadd.f32 %v720_v7, %v367_v54  }
 0x310   : > { %v573_v56 = vpop.eup %572 }
 0x311   : > { %v368_v57 = vmul.f32 %v573_v56, %v569_v49  ;;  %v873_v7 = vmov %v369_v55  ;;  %104 = sbr.rel (!%p102_p11) target bundleno = 64 (0x40), region = 79  ;;  %v406_v18 = vmul.f32 (%p102_p11), %v399_v16, %v369_v55 }
 0x312   :  { %v418_v7 = vand.u32 (%p102_p11), 127, %v377_v60 }
 0x313   : > { %v370_v58 = vadd.f32 %v716_v6, %v368_v57   ;;  %v409_v20 = vsel (%p102_p11), %vm346_vm2, %v406_v18, 0.0 }
 0x314   :  { %v421_v10 = vsub.s32 (%p102_p11), %v418_v7, %v378_v63  ;;  %410 = vadd.xlane.f32.xlu0 (%p102_p11), %v409_v20 }
 0x315   : > { %v872_v6 = vmov %v370_v58  ;;  %v407_v0 = vmul.f32 (%p102_p11), %v403_v19, %v370_v58 }
 0x317   :  { %v412_v1 = vsel %vm346_vm2, %v407_v0, 0.0 }
 0x318   :  { %413 = vadd.xlane.f32.xlu0 %v412_v1 }
 0x39d   :  { %v411_v2 = vpop.xlane.xlu0 %410 }
 0x39e   :  { %v422_v4 = vrot.slane %v411_v2, %v421_v10 }
 0x3a1   :  { %v414_v3 = vpop.xlane.xlu0 %413 }
 0x3a2   :  { %v426_v5 = vrot.slane %v414_v3, %v421_v10 }
 0x3a4   :  { %v428_v6 = vsel %vm427_vm3, %v426_v5, %v422_v4 }
 0x3a5   :  { %431 = vst.msk [vmem:[#allocation11] sm:$0x3] %vm430_vm4, %v428_v6 }
 0x3a6   :  { %685 = shalt.err (!%p682_p2)
}
 0x3a7   :  { %441 = dma.vmem_to_hbm [thread:$0]  %s439_s6, 32, %s871_s7, [#allocation4]  }
 0x3a8   :  { %712 = dma.done.wait [#allocation4], 32  }
 0x3a9   :  { %713 = vsyncadd [#allocation4], 4294967264 }
 0x3aa   :  { %445 = vsyncpa [#allocation3], 1 }
 0x3ab   :  { %446 = vsyncpa [#allocation6], 1 }
 0x3ac   :  { %447 = vsyncpa [#allocation9], 1 }
 0x3ad   :  { %448 = vsyncpa [#allocation4], 1 }

</bundles_post_ra>
